<compile_context>
chip_gen: v7x
topology: tpu7x:2x2x1
jax: 0.10.0
libtpu: 0.0.40
codegen_flags: <defaults>
</compile_context>

<pallas_src>
import functools

import jax
import jax.numpy as jnp
import numpy as np
from jax.experimental import pallas as pl
from jax.experimental.pallas import tpu as pltpu


def _policy_kernel(x_ref, w1_ref, b1_ref, w2_ref, b2_ref, wh_ref, bh_ref,
                   out_ref, *, action_dim):
    # bf16 matmul operands (single MXU pass), f32 accumulation; elementwise in f32.
    x = x_ref[...].astype(jnp.bfloat16)                      # [tb, obs]

    # shared trunk: Linear -> ReLU -> Linear -> ReLU
    h = jnp.dot(x, w1_ref[...], preferred_element_type=jnp.float32) + b1_ref[...]
    h = jnp.maximum(h, 0.0)
    h = jnp.dot(h.astype(jnp.bfloat16), w2_ref[...],
                preferred_element_type=jnp.float32) + b2_ref[...]
    h = jnp.maximum(h, 0.0)                                  # [tb, H]
    # (forward()'s extra F.relu on an already-ReLU'd tensor is a no-op -> omitted)

    # fused actor+critic head: one [H, A+1] matmul instead of two tiny ones.
    y = jnp.dot(h.astype(jnp.bfloat16), wh_ref[...],
                preferred_element_type=jnp.float32) + bh_ref[...]   # [tb, A+1]
    logits = y[:, :action_dim]                               # actor logits
    value = y[:, action_dim:]                                # critic value (1 col)

    # numerically-stable softmax over the action logits only
    m = jnp.max(logits, axis=-1, keepdims=True)
    e = jnp.exp(logits - m)
    probs = e / jnp.sum(e, axis=-1, keepdims=True)

    # single store of the fused [tb, A+1] block; wrapper splits probs / value.
    out_ref[...] = jnp.concatenate([probs, value], axis=-1)


def _round_up(x, m):
    return ((x + m - 1) // m) * m


def policy_forward(state, packed_params, *, block_b=128):
    """state: [B, obs_dim] float32. Returns (action_prob [B, A], state_value [B, 1])."""
    w1, b1, w2, b2, wh, bh = packed_params
    B, OBS = state.shape
    H = w1.shape[1]
    A = wh.shape[1] - 1                 # last fused column is the critic value

    # batch tiling: sublane-align small batches, tile big rollout batches over the grid
    tb = min(block_b, _round_up(B, 8))
    Bp = _round_up(B, tb)
    if Bp != B:
        state = jnp.pad(state, ((0, Bp - B), (0, 0)))
    grid = (Bp // tb,)

    rep = lambda i: (0, 0)              # weights/biases: same block every step (no re-DMA)

    bytes_accessed = (
        int(state.size) * state.dtype.itemsize
        + sum(int(p.size) * p.dtype.itemsize for p in packed_params)
        + Bp * (A + 1) * 4)
    cost = pl.CostEstimate(
        flops=2 * Bp * (OBS * H + H * H + H * (A + 1)),
        transcendentals=Bp * A,
        bytes_accessed=int(bytes_accessed))

    out = pl.pallas_call(
        functools.partial(_policy_kernel, action_dim=A),
        out_shape=jax.ShapeDtypeStruct((Bp, A + 1), jnp.float32),
        grid=grid,
        in_specs=[
            pl.BlockSpec((tb, OBS), lambda i: (i, 0)),       # state: batch-tiled
            pl.BlockSpec((OBS, H), rep),                     # w1 (bf16)
            pl.BlockSpec((1, H), rep),                       # b1 (f32)
            pl.BlockSpec((H, H), rep),                       # w2 (bf16)
            pl.BlockSpec((1, H), rep),                       # b2 (f32)
            pl.BlockSpec((H, A + 1), rep),                   # fused actor|critic weight (bf16)
            pl.BlockSpec((1, A + 1), rep),                   # fused actor|critic bias (f32)
        ],
        out_specs=pl.BlockSpec((tb, A + 1), lambda i: (i, 0)),
        compiler_params=pltpu.CompilerParams(
            dimension_semantics=("parallel",)),              # v7x: batch splits over 2 TCs
        cost_estimate=cost,
    )(state, w1, b1, w2, b2, wh, bh)

    probs = out[:B, :A]
    value = out[:B, A:]
    return probs, value


def init_params(key, obs_dim, hidden, action_dim):
    """PyTorch-style init: U(-1/sqrt(fan_in), 1/sqrt(fan_in)). Weights as [in, out], f32."""
    def linear(k, fan_in, fan_out):
        kw, kb = jax.random.split(k)
        bound = 1.0 / np.sqrt(fan_in)
        w = jax.random.uniform(kw, (fan_in, fan_out), jnp.float32, -bound, bound)
        b = jax.random.uniform(kb, (1, fan_out), jnp.float32, -bound, bound)
        return w, b

    k1, k2, k3, k4 = jax.random.split(key, 4)
    w1, b1 = linear(k1, obs_dim, hidden)
    w2, b2 = linear(k2, hidden, hidden)
    wa, ba = linear(k3, hidden, action_dim)
    wc, bc = linear(k4, hidden, 1)
    return (w1, b1, w2, b2, wa, ba, wc, bc)


def pack_params(params):
    """Fuse actor/critic heads and store weights in bf16 (biases stay f32)."""
    w1, b1, w2, b2, wa, ba, wc, bc = params
    wh = jnp.concatenate([wa, wc], axis=1)      # [H, A+1]
    bh = jnp.concatenate([ba, bc], axis=1)      # [1, A+1]
    return (w1.astype(jnp.bfloat16), b1.astype(jnp.float32),
            w2.astype(jnp.bfloat16), b2.astype(jnp.float32),
            wh.astype(jnp.bfloat16), bh.astype(jnp.float32))


def _reference_forward(state, packed_params):
    """Pure-JAX reference using the same bf16-operand / f32-accumulate math."""
    w1, b1, w2, b2, wh, bh = packed_params
    A = wh.shape[1] - 1
    dot = lambda a, w: jnp.dot(a.astype(jnp.bfloat16), w,
                               preferred_element_type=jnp.float32)
    h = jnp.maximum(dot(state, w1) + b1, 0.0)
    h = jnp.maximum(dot(h, w2) + b2, 0.0)
    y = dot(h, wh) + bh
    probs = jax.nn.softmax(y[:, :A], axis=-1)
    value = y[:, A:]
    return probs, value


if __name__ == "__main__":
    # Small, env-like shapes (e.g. LunarLander-v2: obs_dim=8, discrete action_dim=4).
    # B=8 is sublane-aligned; the wrapper transparently scales to large rollout batches.
    B, OBS, HIDDEN, ACT = 8, 8, 256, 4

    key = jax.random.PRNGKey(0)
    k_params, k_state = jax.random.split(key)
    raw_params = init_params(k_params, OBS, HIDDEN, ACT)
    packed = pack_params(raw_params)
    state = jax.random.normal(k_state, (B, OBS), jnp.float32)

    probs, value = policy_forward(state, packed)
    jax.block_until_ready((probs, value))

    ref_probs, ref_value = _reference_forward(state, packed)
    np.testing.assert_allclose(np.asarray(probs), np.asarray(ref_probs), rtol=5e-3, atol=5e-3)
    np.testing.assert_allclose(np.asarray(value), np.asarray(ref_value), rtol=5e-3, atol=5e-3)
    assert np.allclose(np.asarray(probs).sum(axis=-1), 1.0, atol=1e-5)

    print("KERNEL_OK")
</pallas_src>

<mosaic_0001>
module attributes {stable_mosaic.version = 11 : i64} {
  func.func @_policy_kernel(%arg0: i32, %arg1: memref<8x8xf32, #tpu.memory_space<vmem>>, %arg2: memref<8x256xbf16, #tpu.memory_space<vmem>>, %arg3: memref<1x256xf32, #tpu.memory_space<vmem>>, %arg4: memref<256x256xbf16, #tpu.memory_space<vmem>>, %arg5: memref<1x256xf32, #tpu.memory_space<vmem>>, %arg6: memref<256x5xbf16, #tpu.memory_space<vmem>>, %arg7: memref<1x5xf32, #tpu.memory_space<vmem>>, %arg8: memref<8x5xf32, #tpu.memory_space<vmem>>) attributes {dimension_semantics = [#tpu.dimension_semantics<parallel>], iteration_bounds = array<i64: 1>, scalar_prefetch = 0 : i64, scratch_operands = 0 : i64, tpu.core_type = #tpu.core_type<tc>, window_params = [{transform_indices = @transform_0, window_bounds = array<i64: 8, 8>}, {pipeline_mode = #tpu.pipeline_mode<synchronous>, transform_indices = @transform_1, window_bounds = array<i64: 8, 256>}, {pipeline_mode = #tpu.pipeline_mode<synchronous>, transform_indices = @transform_2, window_bounds = array<i64: 1, 256>}, {pipeline_mode = #tpu.pipeline_mode<synchronous>, transform_indices = @transform_3, window_bounds = array<i64: 256, 256>}, {pipeline_mode = #tpu.pipeline_mode<synchronous>, transform_indices = @transform_4, window_bounds = array<i64: 1, 256>}, {pipeline_mode = #tpu.pipeline_mode<synchronous>, transform_indices = @transform_5, window_bounds = array<i64: 256, 5>}, {pipeline_mode = #tpu.pipeline_mode<synchronous>, transform_indices = @transform_6, window_bounds = array<i64: 1, 5>}, {transform_indices = @transform_7, window_bounds = array<i64: 8, 5>}]} {
    %c0 = arith.constant 0 : index
    %c0_0 = arith.constant 0 : index
    %0 = vector.load %arg1[%c0, %c0_0] : memref<8x8xf32, #tpu.memory_space<vmem>>, vector<8x8xf32>
    %1 = arith.truncf %0 : vector<8x8xf32> to vector<8x8xbf16>
    %c0_1 = arith.constant 0 : index
    %c0_2 = arith.constant 0 : index
    %2 = vector.load %arg2[%c0_1, %c0_2] : memref<8x256xbf16, #tpu.memory_space<vmem>>, vector<8x256xbf16>
    %cst = arith.constant dense<0.000000e+00> : vector<8x256xf32>
    %3 = tpu.matmul %1, %2, %cst {dimension_numbers = #tpu.dot_dimension_numbers<[1], [0], [0], [1], [0, 0, 1, 1], [], []>} : vector<8x8xbf16>, vector<8x256xbf16>, vector<8x256xf32> -> vector<8x256xf32>
    %c0_3 = arith.constant 0 : index
    %c0_4 = arith.constant 0 : index
    %4 = vector.load %arg3[%c0_3, %c0_4] : memref<1x256xf32, #tpu.memory_space<vmem>>, vector<1x256xf32>
    %5 = vector.broadcast %4 : vector<1x256xf32> to vector<8x256xf32>
    %6 = arith.addf %3, %5 : vector<8x256xf32>
    %cst_5 = arith.constant 0.000000e+00 : f32
    %7 = vector.broadcast %cst_5 : f32 to vector<8x256xf32>
    %8 = arith.maximumf %6, %7 : vector<8x256xf32>
    %9 = arith.truncf %8 : vector<8x256xf32> to vector<8x256xbf16>
    %c0_6 = arith.constant 0 : index
    %c0_7 = arith.constant 0 : index
    %10 = vector.load %arg4[%c0_6, %c0_7] : memref<256x256xbf16, #tpu.memory_space<vmem>>, vector<256x256xbf16>
    %cst_8 = arith.constant dense<0.000000e+00> : vector<8x256xf32>
    %11 = tpu.matmul %9, %10, %cst_8 {dimension_numbers = #tpu.dot_dimension_numbers<[1], [0], [0], [1], [0, 0, 1, 1], [], []>} : vector<8x256xbf16>, vector<256x256xbf16>, vector<8x256xf32> -> vector<8x256xf32>
    %c0_9 = arith.constant 0 : index
    %c0_10 = arith.constant 0 : index
    %12 = vector.load %arg5[%c0_9, %c0_10] : memref<1x256xf32, #tpu.memory_space<vmem>>, vector<1x256xf32>
    %13 = vector.broadcast %12 : vector<1x256xf32> to vector<8x256xf32>
    %14 = arith.addf %11, %13 : vector<8x256xf32>
    %cst_11 = arith.constant 0.000000e+00 : f32
    %15 = vector.broadcast %cst_11 : f32 to vector<8x256xf32>
    %16 = arith.maximumf %14, %15 : vector<8x256xf32>
    %17 = arith.truncf %16 : vector<8x256xf32> to vector<8x256xbf16>
    %c0_12 = arith.constant 0 : index
    %c0_13 = arith.constant 0 : index
    %18 = vector.load %arg6[%c0_12, %c0_13] : memref<256x5xbf16, #tpu.memory_space<vmem>>, vector<256x5xbf16>
    %cst_14 = arith.constant dense<0.000000e+00> : vector<8x5xf32>
    %19 = tpu.matmul %17, %18, %cst_14 {dimension_numbers = #tpu.dot_dimension_numbers<[1], [0], [0], [1], [0, 0, 1, 1], [], []>} : vector<8x256xbf16>, vector<256x5xbf16>, vector<8x5xf32> -> vector<8x5xf32>
    %c0_15 = arith.constant 0 : index
    %c0_16 = arith.constant 0 : index
    %20 = vector.load %arg7[%c0_15, %c0_16] : memref<1x5xf32, #tpu.memory_space<vmem>>, vector<1x5xf32>
    %21 = vector.broadcast %20 : vector<1x5xf32> to vector<8x5xf32>
    %22 = arith.addf %19, %21 : vector<8x5xf32>
    %23 = vector.extract_strided_slice %22 {offsets = [0, 0], sizes = [8, 4], strides = [1, 1]} : vector<8x5xf32> to vector<8x4xf32>
    %24 = vector.extract_strided_slice %22 {offsets = [0, 4], sizes = [8, 1], strides = [1, 1]} : vector<8x5xf32> to vector<8x1xf32>
    %cst_17 = arith.constant dense<0xFF800000> : vector<8xf32>
    %25 = vector.multi_reduction <maximumf>, %23, %cst_17 [1] : vector<8x4xf32> to vector<8xf32>
    %26 = vector.shape_cast %25 : vector<8xf32> to vector<8x1xf32>
    %27 = vector.broadcast %26 : vector<8x1xf32> to vector<8x4xf32>
    %28 = arith.subf %23, %27 : vector<8x4xf32>
    %29 = math.exp %28 : vector<8x4xf32>
    %cst_18 = arith.constant dense<0.000000e+00> : vector<8xf32>
    %30 = vector.multi_reduction <add>, %29, %cst_18 [1] : vector<8x4xf32> to vector<8xf32>
    %31 = vector.shape_cast %30 : vector<8xf32> to vector<8x1xf32>
    %32 = vector.broadcast %31 : vector<8x1xf32> to vector<8x4xf32>
    %33 = arith.divf %29, %32 : vector<8x4xf32>
    %34 = tpu.concatenate %33, %24 in 1 : vector<8x4xf32>, vector<8x1xf32> -> vector<8x5xf32>
    %c0_19 = arith.constant 0 : index
    %c0_20 = arith.constant 0 : index
    %35 = vector.load %arg8[%c0_19, %c0_20] : memref<8x5xf32, #tpu.memory_space<vmem>>, vector<8x5xf32>
    tpu.vector_store %arg8[%c0_19, %c0_20], %34 {strides = array<i32>} : memref<8x5xf32, #tpu.memory_space<vmem>>, vector<8x5xf32>,
    return
  }
  func.func @transform_0(%arg0: i32) -> (i32, i32) {
    %c0_i32 = arith.constant 0 : i32
    %c0_i32_0 = arith.constant 0 : i32
    return %arg0, %c0_i32 : i32, i32
  }
  func.func @transform_1(%arg0: i32) -> (i32, i32) {
    %c0_i32 = arith.constant 0 : i32
    %c0_i32_0 = arith.constant 0 : i32
    %c0_i32_1 = arith.constant 0 : i32
    return %c0_i32, %c0_i32_0 : i32, i32
  }
  func.func @transform_2(%arg0: i32) -> (i32, i32) {
    %c0_i32 = arith.constant 0 : i32
    %c0_i32_0 = arith.constant 0 : i32
    %c0_i32_1 = arith.constant 0 : i32
    return %c0_i32, %c0_i32_0 : i32, i32
  }
  func.func @transform_3(%arg0: i32) -> (i32, i32) {
    %c0_i32 = arith.constant 0 : i32
    %c0_i32_0 = arith.constant 0 : i32
    %c0_i32_1 = arith.constant 0 : i32
    return %c0_i32, %c0_i32_0 : i32, i32
  }
  func.func @transform_4(%arg0: i32) -> (i32, i32) {
    %c0_i32 = arith.constant 0 : i32
    %c0_i32_0 = arith.constant 0 : i32
    %c0_i32_1 = arith.constant 0 : i32
    return %c0_i32, %c0_i32_0 : i32, i32
  }
  func.func @transform_5(%arg0: i32) -> (i32, i32) {
    %c0_i32 = arith.constant 0 : i32
    %c0_i32_0 = arith.constant 0 : i32
    %c0_i32_1 = arith.constant 0 : i32
    return %c0_i32, %c0_i32_0 : i32, i32
  }
  func.func @transform_6(%arg0: i32) -> (i32, i32) {
    %c0_i32 = arith.constant 0 : i32
    %c0_i32_0 = arith.constant 0 : i32
    %c0_i32_1 = arith.constant 0 : i32
    return %c0_i32, %c0_i32_0 : i32, i32
  }
  func.func @transform_7(%arg0: i32) -> (i32, i32) {
    %c0_i32 = arith.constant 0 : i32
    %c0_i32_0 = arith.constant 0 : i32
    return %arg0, %c0_i32 : i32, i32
  }
}

</mosaic_0001>

<bundles_post_ra>
// kernel: tpu_custom_call.1
= control target key start
LH: loop header
LB: loop body
LE: loop exit
PB: predicated region body
PF: predicated region fallthrough
CT: control target
= control target key end

     0   :  { %12 = vsyncpa [#allocation3], 0  ;;  %s905_s0 = inlined_call_operand.vmem [shape: f32[8,8], index: 0, kind: input, shape index: {}]   ;;  %s906_s1 = inlined_call_operand.vmem [shape: bf16[8,256], index: 1, kind: input, shape index: {}]   ;;  %s907_s2 = inlined_call_operand.vmem [shape: f32[1,256], index: 2, kind: input, shape index: {}]   ;;  %s908_s3 = inlined_call_operand.hbm [shape: bf16[256,256], index: 3, kind: input, shape index: {}]   ;;  %s909_s4 = inlined_call_operand.vmem [shape: f32[1,256], index: 4, kind: input, shape index: {}]   ;;  %s910_s5 = inlined_call_operand.vmem [shape: bf16[256,5], index: 5, kind: input, shape index: {}]   ;;  %s911_s6 = inlined_call_operand.vmem [shape: f32[1,5], index: 6, kind: input, shape index: {}]   ;;  %s912_s7 = inlined_call_operand.hbm [shape: f32[8,5], index: 7, kind: output, shape index: {}]  }
   0x1   :  { %13 = vsyncpa [#allocation4], 0  ;;  %s770_s24 = smov [#allocation2]   ;;  %s722_s28 = scalar_lea.hbm %s908_s3, 4096 }
   0x2   :  { %s25_s25 = sshll.u32 %s770_s24, 4  ;;  %p723_p0 = scmp.ne.s32.totalorder %s908_s3, %s722_s28  ;;  %s26_s25 = int_to_ptr.vmem [resolvable:$true] %s25_s25 }
   0x3   :  { %p726_p1 = scmp.lt.u32.totalorder %s722_s28, %s908_s3 }
   0x5   :  { %p728_p2 = pnand %p726_p1, %p723_p0 }
   0x7   :  { %731 = shalt.err (!%p728_p2)
}
   0x8   :  { %s732_s10 = scalar_lea.vmem %s26_s25, 4096  ;;  %p737_p4 = scmp.lt.s32.totalorder %s26_s25, %s26_s25 }
   0x9   :  { %p733_p3 = scmp.ne.s32.totalorder %s26_s25, %s732_s10  ;;  %p738_p5 = scmp.lt.s32.totalorder %s732_s10, %s732_s10 }
   0xb   :  { %p739_p6 = por %p738_p5, %p737_p4 }
   0xd   :  { %p740_p7 = pnand %p739_p6, %p733_p3 }
   0xf   :  { %743 = shalt.err (!%p740_p7)
}
  0x10   :  { %s771_s11 = smov 128   ;;  %s772_s12 = smov 8  }
  0x11   :  { %31 = dma.hbm_to_vmem [thread:$0]  %s908_s3, 4096, %s26_s25, [#allocation3], %s771_s11, %s771_s11, %s772_s12  }
  0x12   :  { %766 = dma.done.wait [#allocation3], 4096  }
  0x13   :  { %767 = vsyncadd [#allocation3], 4294963200  ;;  %v773_v0 = vmov 0   ;;  %v44_v1 = vld [vmem:[%s906_s1] sm:$0xff]  ;;  %vm66_vm0 = vcmask 1043456   ;;  %vm62_vm1 = vcmask 64512   ;;  %v47_v51 = vlaneseq }
  0x14   :  { %105 = vmatprep.mubr.bf16.mxu0 %v773_v0  ;;  %v42_v2 = vld [vmem:[%s905_s0] sm:$0xff]  ;;  %v573_v3 = vcombine.high %v44_v1, %v44_v1  ;;  %v572_v4 = vcombine.low %v44_v1, %v44_v1  ;;  %v657_v7 = vld [vmem:[#allocation2 + $0x14] ss:$8 sps:$4 sm:$0xff]   ;;  %v659_v10 = vld [vmem:[#allocation2 + $0x10] ss:$8 sps:$4 sm:$0xff]   ;;  %vm542_vm2 = vcmask 31744  }
  0x15   :  { %v654_v5 = vld [vmem:[#allocation2 + $0x4] ss:$8 sps:$4 sm:$0xff]   ;;  %v656_v6 = vld [vmem:[#allocation2] ss:$8 sps:$4 sm:$0xff]   ;;  %v43_v9 = vpack.c.bf16 %v42_v2, %v42_v2  ;;  %v663_v13 = vld [vmem:[#allocation2 + $0x34] ss:$8 sps:$4 sm:$0xff]  }
  0x16   :  { %574 = vmatprep.subr.msk.bf16.mxu0 %vm66_vm0, %v573_v3  ;;  %v68_v8 = vsel %vm66_vm0, %v572_v4, 0  ;;  %322 = vmatprep.subr.bf16.mxu1 %v654_v5  ;;  %v660_v11 = vld [vmem:[#allocation2 + $0x24] ss:$8 sps:$4 sm:$0xff]   ;;  %v662_v12 = vld [vmem:[#allocation2 + $0x20] ss:$8 sps:$4 sm:$0xff]   ;;  %v706_v43 = vld [vmem:[%s910_s5 + $0x50] sm:$0xff]  }
  0x17   :  { %74 = vmatpush1.bf16.msra.mxu0 %v68_v8  ;;  %323 = vmatpush1.bf16.msra.mxu1 %v656_v6  ;;  %v665_v14 = vld [vmem:[#allocation2 + $0x30] ss:$8 sps:$4 sm:$0xff]   ;;  %v666_v15 = vld [vmem:[#allocation2 + $0x44] ss:$8 sps:$4 sm:$0xff]   ;;  %v668_v16 = vld [vmem:[#allocation2 + $0x40] ss:$8 sps:$4 sm:$0xff]  }
  0x18   :  { %324 = vmatprep.subr.bf16.mxu1 %v657_v7  ;;  %v669_v17 = vld [vmem:[#allocation2 + $0x54] ss:$8 sps:$4 sm:$0xff]   ;;  %v671_v18 = vld [vmem:[#allocation2 + $0x50] ss:$8 sps:$4 sm:$0xff]   ;;  %v672_v19 = vld [vmem:[#allocation2 + $0x64] ss:$8 sps:$4 sm:$0xff]  }
  0x19   :  { %v674_v20 = vld [vmem:[#allocation2 + $0x60] ss:$8 sps:$4 sm:$0xff]   ;;  %v675_v21 = vld [vmem:[#allocation2 + $0x74] ss:$8 sps:$4 sm:$0xff]   ;;  %v677_v22 = vld [vmem:[#allocation2 + $0x70] ss:$8 sps:$4 sm:$0xff]  }
  0x1a   :  { %575 = vmatmul.mubr.msk.bf16.vlgmr.msra.gmra.mrb[0].mxu0 %vm62_vm1, %v43_v9  ;;  %v678_v23 = vld [vmem:[#allocation2 + $0x84] ss:$8 sps:$4 sm:$0xff]   ;;  %v680_v24 = vld [vmem:[#allocation2 + $0x80] ss:$8 sps:$4 sm:$0xff]   ;;  %v681_v25 = vld [vmem:[#allocation2 + $0x94] ss:$8 sps:$4 sm:$0xff]  }
  0x1b   :  { %325 = vmatpush1.bf16.msra.mxu1 %v659_v10  ;;  %v683_v26 = vld [vmem:[#allocation2 + $0x90] ss:$8 sps:$4 sm:$0xff]   ;;  %v684_v27 = vld [vmem:[#allocation2 + $0xa4] ss:$8 sps:$4 sm:$0xff]   ;;  %v686_v28 = vld [vmem:[#allocation2 + $0xa0] ss:$8 sps:$4 sm:$0xff]  }
  0x1c   :  { %326 = vmatprep.subr.bf16.mxu1 %v660_v11  ;;  %v687_v29 = vld [vmem:[#allocation2 + $0xb4] ss:$8 sps:$4 sm:$0xff]   ;;  %v689_v30 = vld [vmem:[#allocation2 + $0xb0] ss:$8 sps:$4 sm:$0xff]   ;;  %v690_v31 = vld [vmem:[#allocation2 + $0xc4] ss:$8 sps:$4 sm:$0xff]  }
  0x1d   :  { %v692_v32 = vld [vmem:[#allocation2 + $0xc0] ss:$8 sps:$4 sm:$0xff]   ;;  %v693_v33 = vld [vmem:[#allocation2 + $0xd4] ss:$8 sps:$4 sm:$0xff]   ;;  %v695_v34 = vld [vmem:[#allocation2 + $0xd0] ss:$8 sps:$4 sm:$0xff]  }
  0x1e   :  { %v696_v35 = vld [vmem:[#allocation2 + $0xe4] ss:$8 sps:$4 sm:$0xff]   ;;  %v698_v36 = vld [vmem:[#allocation2 + $0xe0] ss:$8 sps:$4 sm:$0xff]   ;;  %v699_v37 = vld [vmem:[#allocation2 + $0xf4] ss:$8 sps:$4 sm:$0xff]  }
  0x1f   :  { %327 = vmatpush1.bf16.msra.mxu1 %v662_v12  ;;  %v701_v38 = vld [vmem:[#allocation2 + $0xf0] ss:$8 sps:$4 sm:$0xff]   ;;  %v702_v39 = vld [vmem:[%s910_s5 + $0x40] sm:$0xff]   ;;  %v704_v41 = vld [vmem:[%s910_s5 + $0x48] sm:$0xff]   ;;  %v48_v52 = vshrl.u32 %v47_v51, 7  ;;  %vm555_vm3 = vcmask 39936  }
  0x20   :  { %328 = vmatprep.subr.bf16.mxu1 %v663_v13  ;;  %v703_v40 = vld [vmem:[%s910_s5] sm:$0xff]   ;;  %625 = vmatprep.subr.bf16.mxu0 %v702_v39  ;;  %v705_v42 = vld [vmem:[%s910_s5 + $0x8] sm:$0xff]   ;;  %v707_v44 = vld [vmem:[%s910_s5 + $0x10] sm:$0xff]  }
  0x21   :  { %626 = vmatpush3.bf16.msra.mxu0 %v703_v40  ;;  %v708_v45 = vld [vmem:[%s910_s5 + $0x58] sm:$0xff]   ;;  %v710_v47 = vld [vmem:[%s910_s5 + $0x60] sm:$0xff]   ;;  %v712_v49 = vld [vmem:[%s910_s5 + $0x68] sm:$0xff]   ;;  %v49_v53 = vsub.s32 0, %v48_v52  ;;  %v53_v55 = vsub.s32 1, %v48_v52 }
  0x22   :  { %627 = vmatprep.subr.bf16.mxu0 %v704_v41  ;;  %v709_v46 = vld [vmem:[%s910_s5 + $0x18] sm:$0xff]   ;;  %v711_v48 = vld [vmem:[%s910_s5 + $0x20] sm:$0xff]   ;;  %v713_v50 = vld [vmem:[%s910_s5 + $0x28] sm:$0xff]  }
  0x23   :  { %329 = vmatpush1.bf16.msra.mxu1 %v665_v14  ;;  %v45_v54 = vld [vmem:[%s907_s2] sm:$0x3]  ;;  %v714_v4 = vld [vmem:[%s910_s5 + $0x70] sm:$0xff]   ;;  %v716_v6 = vld [vmem:[%s910_s5 + $0x78] sm:$0xff]  }
  0x24   :  { %330 = vmatprep.subr.bf16.mxu1 %v666_v15  ;;  %v50_v56 = vrot.slane %v45_v54, %v49_v53  ;;  %v54_v57 = vrot.slane %v45_v54, %v53_v55  ;;  %v715_v5 = vld [vmem:[%s910_s5 + $0x30] sm:$0xff]   ;;  %v717_v7 = vld [vmem:[%s910_s5 + $0x38] sm:$0xff]   ;;  %v150_v8 = vld [vmem:[%s909_s4] sm:$0x3]  ;;  %s774_s4 = smov [#allocation5]  }
  0x25   :  { %628 = vmatpush3.bf16.msra.mxu0 %v705_v42  ;;  %v155_v9 = vrot.slane %v150_v8, %v49_v53  ;;  %v159_v10 = vrot.slane %v150_v8, %v53_v55 }
  0x26   :  { %629 = vmatprep.subr.bf16.mxu0 %v706_v43 }
  0x27   :  { %331 = vmatpush1.bf16.msra.mxu1 %v668_v16 }
  0x28   :  { %332 = vmatprep.subr.bf16.mxu1 %v669_v17 }
  0x29   :  { %630 = vmatpush3.bf16.msra.mxu0 %v707_v44 }
  0x2a   :  { %631 = vmatprep.subr.bf16.mxu0 %v708_v45 }
  0x2b   :  { %333 = vmatpush1.bf16.msra.mxu1 %v671_v18 }
  0x2c   :  { %334 = vmatprep.subr.bf16.mxu1 %v672_v19 }
  0x2d   :  { %632 = vmatpush3.bf16.msra.mxu0 %v709_v46 }
  0x2e   :  { %633 = vmatprep.subr.bf16.mxu0 %v710_v47 }
  0x2f   :  { %335 = vmatpush1.bf16.msra.mxu1 %v674_v20 }
  0x30   :  { %336 = vmatprep.subr.bf16.mxu1 %v675_v21 }
  0x31   :  { %634 = vmatpush3.bf16.msra.mxu0 %v711_v48 }
  0x32   :  { %635 = vmatprep.subr.bf16.mxu0 %v712_v49 }
  0x33   :  { %337 = vmatpush1.bf16.msra.mxu1 %v677_v22  ;;  %v608_v22 = vld [vmem:[%s911_s6] ss:$0 sm:$0xff]  ;;  %s563_s6 = sshll.u32 %s774_s4, 4  ;;  %s564_s6 = int_to_ptr.vmem [resolvable:$true] %s563_s6 }
  0x34   :  { %338 = vmatprep.subr.bf16.mxu1 %v678_v23  ;;  %s744_s26 = scalar_lea.vmem %s564_s6, 128  ;;  %p749_p9 = scmp.lt.s32.totalorder %s564_s6, %s564_s6 }
  0x35   :  { %636 = vmatpush3.bf16.msra.mxu0 %v713_v50  ;;  %p745_p8 = scmp.ne.s32.totalorder %s564_s6, %s744_s26  ;;  %p750_p10 = scmp.lt.s32.totalorder %s744_s26, %s744_s26 }
  0x36   :  { %637 = vmatprep.subr.bf16.mxu0 %v714_v4 }
  0x37   :  { %339 = vmatpush1.bf16.msra.mxu1 %v680_v24  ;;  %p751_p11 = por %p750_p10, %p749_p9 }
  0x38   :  { %340 = vmatprep.subr.bf16.mxu1 %v681_v25 }
  0x39   :  { %638 = vmatpush3.bf16.msra.mxu0 %v715_v5  ;;  %p752_p12 = pnand %p751_p11, %p745_p8 }
  0x3a   :  { %639 = vmatprep.subr.bf16.mxu0 %v716_v6 }
  0x3b   :  { %341 = vmatpush1.bf16.msra.mxu1 %v683_v26 }
  0x3c   :  { %342 = vmatprep.subr.bf16.mxu1 %v684_v27 }
  0x3d   :  { %640 = vmatpush3.bf16.msra.mxu0 %v717_v7 }
  0x3f   :  { %343 = vmatpush1.bf16.msra.mxu1 %v686_v28 }
  0x40   :  { %344 = vmatprep.subr.bf16.mxu1 %v687_v29 }
  0x43   :  { %345 = vmatpush1.bf16.msra.mxu1 %v689_v30 }
  0x44   :  { %346 = vmatprep.subr.bf16.mxu1 %v690_v31 }
  0x47   :  { %347 = vmatpush1.bf16.msra.mxu1 %v692_v32 }
  0x48   :  { %348 = vmatprep.subr.bf16.mxu1 %v693_v33 }
  0x4b   :  { %349 = vmatpush1.bf16.msra.mxu1 %v695_v34 }
  0x4c   :  { %350 = vmatprep.subr.bf16.mxu1 %v696_v35 }
  0x4f   :  { %351 = vmatpush1.bf16.msra.mxu1 %v698_v36 }
  0x50   :  { %352 = vmatprep.subr.bf16.mxu1 %v699_v37 }
  0x53   :  { %353 = vmatpush1.bf16.msra.mxu1 %v701_v38 }
  0xed   :  { %v107_v58 = vpop.f32.mrb[0].mxu0 }
  0xee   :  { %v108_v59 = vadd.f32 %v107_v58, %v50_v56  ;;  %v109_v60 = vpop.f32.mrb[1].mxu0 }
  0xef   :  { %v110_v61 = vadd.f32 %v109_v60, %v54_v57  ;;  %v111_v62 = vpop.f32.mrb[2].mxu0 }
  0xf0   :  { %v114_v63 = vmax.f32 %v108_v59, 0.0  ;;  %v112_v0 = vpop.f32.mrb[3].mxu0 }
  0xf1   :  { %v115_v1 = vmax.f32 %v110_v61, 0.0 }
  0xf2   :  { %v116_v3 = vpack.c.bf16 %v114_v63, %v114_v63 }
  0xf3   :  { %v117_v2 = vpack.c.bf16 %v115_v1, %v115_v1 }
  0xf5   :  { %354 = vmatprep.mubr.bf16.mxu1 %v117_v2 }
  0xf6   :  { %355 = vmatmul.mubr.bf16.vlgmr.msra.gmra.mrb[0].mxu1 %v116_v3 }
 0x1c9   :  { %v356_v11 = vpop.f32.mrb[0].mxu1 }
 0x1ca   :  { %v357_v12 = vadd.f32 %v356_v11, %v155_v9  ;;  %v358_v13 = vpop.f32.mrb[1].mxu1 }
 0x1cb   :  { %v359_v14 = vadd.f32 %v358_v13, %v159_v10  ;;  %v360_v15 = vpop.f32.mrb[2].mxu1 }
 0x1cc   :  { %v363_v16 = vmax.f32 %v357_v12, 0.0  ;;  %v361_v17 = vpop.f32.mrb[3].mxu1 }
 0x1cd   :  { %v364_v18 = vmax.f32 %v359_v14, 0.0 }
 0x1ce   :  { %v365_v20 = vpack.c.bf16 %v363_v16, %v363_v16 }
 0x1cf   :  { %v366_v19 = vpack.c.bf16 %v364_v18, %v364_v18 }
 0x1d1   :  { %534 = vmatprep.mubr.bf16.mxu0 %v366_v19 }
 0x1d2   :  { %535 = vmatmul.mubr.bf16.vlgmr.msra.gmra.mrb[4].mxu0 %v365_v20 }
 0x2a5   :  { %v641_v21 = vpop.f32.mrb[4].mxu0 }
 0x2a6   :  { %v642_v23 = vpop.f32.mrb[5].mxu0 }
 0x2a7   :  { %v643_v24 = vadd.f32 %v642_v23, %v641_v21  ;;  %v644_v25 = vpop.f32.mrb[6].mxu0 }
 0x2a8   :  { %v645_v26 = vpop.f32.mrb[7].mxu0 }
 0x2a9   :  { %v537_v27 = vadd.f32 %v643_v24, %v608_v22 }
 0x2ab   :  { %v543_v28 = vsel %vm542_vm2, %v537_v27, -inf }
 0x2ac   :  { %544 = vmax.xlane.f32.xlu0 %v543_v28 }
 0x339   :  { %v545_v29 = vpop.xlane.xlu0 %544 }
 0x33a   :  { %v546_v30 = vsub.f32 %v537_v27, %v545_v29 }
 0x33c   :  { %v547_v31 = vmul.f32 1.442695, %v546_v30 }
 0x33e   :  { %718 = vpow2.f32 %v547_v31 }
 0x348   :  { %v719_v32 = vpop.eup %718 }
 0x349   :  { %v549_v33 = vsel %vm542_vm2, %v719_v32, 0.0 }
 0x34a   :  { %550 = vadd.xlane.f32.xlu0 %v549_v33 }
 0x3d7   :  { %v551_v34 = vpop.xlane.xlu0 %550 }
 0x3d8   :  { %720 = vrcp.f32 %v551_v34 }
 0x3e2   :  { %v721_v35 = vpop.eup %720 }
 0x3e3   :  { %v553_v36 = vmul.f32 %v721_v35, %v719_v32 }
 0x3e5   :  { %v554_v37 = vsel %vm542_vm2, %v553_v36, %v537_v27 }
 0x3e6   :  { %556 = vst.msk [vmem:[#allocation5] sm:$0xff] %vm555_vm3, %v554_v37 }
 0x3e7   :  { %755 = shalt.err (!%p752_p12)
}
 0x3e8   :  { %s756_s29 = scalar_lea.hbm %s912_s7, 128 }
 0x3e9   :  { %p757_p13 = scmp.ne.s32.totalorder %s912_s7, %s756_s29  ;;  %p760_p0 = scmp.lt.u32.totalorder %s756_s29, %s912_s7 }
 0x3eb   :  { %p762_p1 = pnand %p760_p0, %p757_p13 }
 0x3ed   :  { %765 = shalt.err (!%p762_p1)
}
 0x3ee   :  { %566 = dma.vmem_to_hbm [thread:$0]  %s564_s6, 128, %s912_s7, [#allocation4]  }
 0x3ef   :  { %768 = dma.done.wait [#allocation4], 128  }
 0x3f0   :  { %769 = vsyncadd [#allocation4], 4294967168 }
 0x3f1   :  { %570 = vsyncpa [#allocation3], 1 }
 0x3f2   :  { %571 = vsyncpa [#allocation4], 1 }

</bundles_post_ra>
